<compile_context>
chip_gen: v6e
topology: v6e:2x2x1
jax: 0.10.0
libtpu: 0.0.40
codegen_flags: <defaults>
</compile_context>

<pallas_src>
import jax
import jax.numpy as jnp
from jax import lax
from jax.experimental import pallas as pl
from jax.experimental.pallas import tpu as pltpu


def _round_up(a, m):
    return (a + m - 1) // m * m


# ---------------------------------------------------------------------------
# Kernels
# ---------------------------------------------------------------------------

def _readout_kernel(x_ref, w_ref, b_ref, o_ref):
    # Collapsed-K path (one matmul per output tile).
    # x_ref : (tb, Kp)  bf16   — input rows
    # w_ref : (tn, Kp)  bf16   — weight in native (O, K) layout
    # b_ref : (1,  tn)  f32    — bias slice
    # o_ref : (tb, tn)  f32    — lane-dense output tile
    acc = lax.dot_general(
        x_ref[...], w_ref[...],
        dimension_numbers=(((1,), (1,)), ((), ())),   # NT: contract K with K
        preferred_element_type=jnp.float32)
    o_ref[...] = jnp.tanh(acc + b_ref[...]).astype(o_ref.dtype)


def _readout_kernel_ksplit(x_ref, w_ref, b_ref, o_ref):
    # Fallback path for very large K: accumulate directly into the resident
    # f32 output tile (no scratch), bias + tanh at the last k step.
    k = pl.program_id(2)

    @pl.when(k == 0)
    def _():
        o_ref[...] = jnp.zeros_like(o_ref)

    o_ref[...] += lax.dot_general(
        x_ref[...], w_ref[...],
        dimension_numbers=(((1,), (1,)), ((), ())),
        preferred_element_type=jnp.float32)

    @pl.when(k == pl.num_programs(2) - 1)
    def _():
        o_ref[...] = jnp.tanh(o_ref[...] + b_ref[...]).astype(o_ref.dtype)


# ---------------------------------------------------------------------------
# Tiling / wrapper
# ---------------------------------------------------------------------------

_VMEM_BUDGET = 12 * 1024 * 1024     # conservative: fits v5e's 16 MiB default scoped


def _vmem_bytes(tb, tn, tk, in_itemsize):
    # Double-buffered x/w input tiles + double-buffered f32 output tile + bias.
    x_tile = tb * tk * in_itemsize
    w_tile = tn * tk * in_itemsize
    o_tile = tb * tn * 4
    b_tile = tn * 4
    return 2 * (x_tile + w_tile + o_tile + b_tile)


def _select_tiles(B, K, O, in_itemsize):
    tb = min(256, _round_up(B, 16))        # sublane multiple (bf16-safe)
    tn = min(512, _round_up(O, 128))       # lane-dense output
    Kp = _round_up(K, 128)
    if _vmem_bytes(tb, tn, Kp, in_itemsize) <= _VMEM_BUDGET:
        return tb, tn, Kp                  # collapse K entirely
    tk = Kp
    while tk > 512 and _vmem_bytes(tb, tn, tk, in_itemsize) > _VMEM_BUDGET:
        tk //= 2
    tk = max(512, _round_up(tk, 128))
    return tb, tn, tk


def linear_readout(x, w, b, *, compute_dtype=jnp.bfloat16):
    """tanh(x @ w.T + b).

    x: (..., in_features)
    w: (out_features, in_features)   — PyTorch nn.Linear layout (not transposed)
    b: (out_features,)
    compute_dtype: dtype of x/W streamed into the kernel (accumulation is f32).
    """
    x = jnp.asarray(x)
    w = jnp.asarray(w)
    b = jnp.asarray(b, jnp.float32)

    lead_shape = x.shape[:-1]
    K = x.shape[-1]
    O, K2 = w.shape
    assert K == K2, (K, K2)

    x2 = x.reshape(-1, K).astype(compute_dtype)
    w2 = w.astype(compute_dtype)            # native (O, K) layout, no transpose
    B = x2.shape[0]

    in_itemsize = jnp.dtype(compute_dtype).itemsize
    tb, tn, tk = _select_tiles(B, K, O, in_itemsize)
    Bp, Op, Kp = _round_up(B, tb), _round_up(O, tn), _round_up(K, tk)

    # Pad only for ragged shapes (tile-aligned shapes take the zero-copy path;
    # zero-padded K contributes 0 to the accumulation, padded rows/cols cropped).
    if (Bp, Kp) != (B, K):
        x2 = jnp.pad(x2, ((0, Bp - B), (0, Kp - K)))
    if (Op, Kp) != (O, K):
        w2 = jnp.pad(w2, ((0, Op - O), (0, Kp - K)))
    b2 = (b if Op == O else jnp.pad(b, (0, Op - O))).reshape(1, Op)

    if tk == Kp:
        # Common case: K fully resident -> 2-D grid, weight streamed once per
        # output-column tile (its block index is invariant along the inner axis).
        grid = (Op // tn, Bp // tb)          # j outer, i inner
        out = pl.pallas_call(
            _readout_kernel,
            out_shape=jax.ShapeDtypeStruct((Bp, Op), jnp.float32),
            grid=grid,
            in_specs=[
                pl.BlockSpec((tb, Kp), lambda j, i: (i, 0)),   # x
                pl.BlockSpec((tn, Kp), lambda j, i: (j, 0)),   # W (O, K)
                pl.BlockSpec((1, tn), lambda j, i: (0, j)),    # bias
            ],
            out_specs=pl.BlockSpec((tb, tn), lambda j, i: (i, j)),
            compiler_params=pltpu.CompilerParams(
                dimension_semantics=("parallel", "parallel")),
        )(x2, w2, b2)
    else:
        # Huge-K fallback: innermost reduction axis, f32 output tile is the
        # accumulator (stays resident across k).
        grid = (Op // tn, Bp // tb, Kp // tk)
        out = pl.pallas_call(
            _readout_kernel_ksplit,
            out_shape=jax.ShapeDtypeStruct((Bp, Op), jnp.float32),
            grid=grid,
            in_specs=[
                pl.BlockSpec((tb, tk), lambda j, i, k: (i, k)),   # x
                pl.BlockSpec((tn, tk), lambda j, i, k: (j, k)),   # W (O, K)
                pl.BlockSpec((1, tn), lambda j, i, k: (0, j)),    # bias
            ],
            out_specs=pl.BlockSpec((tb, tn), lambda j, i, k: (i, j)),
            compiler_params=pltpu.CompilerParams(
                dimension_semantics=("parallel", "parallel", "arbitrary")),
        )(x2, w2, b2)

    out = out[:B, :O]
    return out.reshape(*lead_shape, O)


def _reference_f32(x, w, b):
    return jnp.tanh(jnp.dot(x, w.T) + b)


if __name__ == "__main__":
    key = jax.random.PRNGKey(0)
    kx, kw, kb = jax.random.split(key, 3)

    # Small shapes consistent with a DeepESN readout: batch of reservoir states.
    B, IN_F, OUT_F = 16, 256, 128
    x = jax.random.normal(kx, (B, IN_F), dtype=jnp.float32)

    # Deterministic init mimicking PyTorch nn.Linear default (uniform +-1/sqrt(fan_in)).
    bound = 1.0 / (IN_F ** 0.5)
    w = jax.random.uniform(kw, (OUT_F, IN_F), jnp.float32, -bound, bound)
    b = jax.random.uniform(kb, (OUT_F,), jnp.float32, -bound, bound)

    out = jax.block_until_ready(linear_readout(x, w, b))
    assert out.shape == (B, OUT_F), out.shape

    # f32 PyTorch-semantics reference; bf16 input cast + f32 accumulation keeps
    # the tanh output well within a few 1e-3 of the f32 result.
    ref = jax.block_until_ready(_reference_f32(x, w, b))
    err = float(jnp.max(jnp.abs(out - ref)))
    assert jnp.allclose(out, ref, rtol=2e-2, atol=2e-2), err

    print("KERNEL_OK")
</pallas_src>

<mosaic_0001>
module attributes {stable_mosaic.version = 11 : i64} {
  func.func @_readout_kernel(%arg0: i32, %arg1: i32, %arg2: memref<16x256xbf16, #tpu.memory_space<vmem>>, %arg3: memref<128x256xbf16, #tpu.memory_space<vmem>>, %arg4: memref<1x128xf32, #tpu.memory_space<vmem>>, %arg5: memref<16x128xf32, #tpu.memory_space<vmem>>) attributes {dimension_semantics = [#tpu.dimension_semantics<parallel>, #tpu.dimension_semantics<parallel>], iteration_bounds = array<i64: 1, 1>, scalar_prefetch = 0 : i64, scratch_operands = 0 : i64, tpu.core_type = #tpu.core_type<tc>, window_params = [{transform_indices = @transform_0, window_bounds = array<i64: 16, 256>}, {transform_indices = @transform_1, window_bounds = array<i64: 128, 256>}, {transform_indices = @transform_2, window_bounds = array<i64: 1, 128>}, {transform_indices = @transform_3, window_bounds = array<i64: 16, 128>}]} {
    %c0 = arith.constant 0 : index
    %c0_0 = arith.constant 0 : index
    %0 = vector.load %arg2[%c0, %c0_0] : memref<16x256xbf16, #tpu.memory_space<vmem>>, vector<16x256xbf16>
    %c0_1 = arith.constant 0 : index
    %c0_2 = arith.constant 0 : index
    %1 = vector.load %arg3[%c0_1, %c0_2] : memref<128x256xbf16, #tpu.memory_space<vmem>>, vector<128x256xbf16>
    %cst = arith.constant dense<0.000000e+00> : vector<16x128xf32>
    %2 = tpu.matmul %0, %1, %cst {dimension_numbers = #tpu.dot_dimension_numbers<[1], [1], [0], [0], [0, 0, 1, 0], [], []>} : vector<16x256xbf16>, vector<128x256xbf16>, vector<16x128xf32> -> vector<16x128xf32>
    %c0_3 = arith.constant 0 : index
    %c0_4 = arith.constant 0 : index
    %3 = vector.load %arg4[%c0_3, %c0_4] : memref<1x128xf32, #tpu.memory_space<vmem>>, vector<1x128xf32>
    %4 = vector.broadcast %3 : vector<1x128xf32> to vector<16x128xf32>
    %5 = arith.addf %2, %4 : vector<16x128xf32>
    %6 = math.tanh %5 : vector<16x128xf32>
    %c0_5 = arith.constant 0 : index
    %c0_6 = arith.constant 0 : index
    %7 = vector.load %arg5[%c0_5, %c0_6] : memref<16x128xf32, #tpu.memory_space<vmem>>, vector<16x128xf32>
    tpu.vector_store %arg5[%c0_5, %c0_6], %6 {strides = array<i32>} : memref<16x128xf32, #tpu.memory_space<vmem>>, vector<16x128xf32>,
    return
  }
  func.func @transform_0(%arg0: i32, %arg1: i32) -> (i32, i32) {
    %c0_i32 = arith.constant 0 : i32
    %c0_i32_0 = arith.constant 0 : i32
    return %arg1, %c0_i32 : i32, i32
  }
  func.func @transform_1(%arg0: i32, %arg1: i32) -> (i32, i32) {
    %c0_i32 = arith.constant 0 : i32
    %c0_i32_0 = arith.constant 0 : i32
    return %arg0, %c0_i32 : i32, i32
  }
  func.func @transform_2(%arg0: i32, %arg1: i32) -> (i32, i32) {
    %c0_i32 = arith.constant 0 : i32
    %c0_i32_0 = arith.constant 0 : i32
    return %c0_i32, %arg0 : i32, i32
  }
  func.func @transform_3(%arg0: i32, %arg1: i32) -> (i32, i32) {
    %c0_i32 = arith.constant 0 : i32
    return %arg1, %arg0 : i32, i32
  }
}

</mosaic_0001>

<bundles_post_ra>
// kernel: tpu_custom_call.1
= control target key start
LH: loop header
LB: loop body
LE: loop exit
PB: predicated region body
PF: predicated region fallthrough
CT: control target
= control target key end

     0   :  { %8 = vsyncpa [#allocation3], 0  ;;  %s389_s0 = inlined_call_operand.hbm [shape: bf16[16,256], index: 0, kind: input, shape index: {}]   ;;  %s390_s1 = inlined_call_operand.hbm [shape: bf16[128,256], index: 1, kind: input, shape index: {}]   ;;  %s391_s2 = inlined_call_operand.vmem [shape: f32[1,128], index: 2, kind: input, shape index: {}]   ;;  %s392_s3 = inlined_call_operand.hbm [shape: f32[16,128], index: 3, kind: output, shape index: {}]  }
   0x1   :  { %9 = vsyncpa [#allocation6], 0 }
   0x2   :  { %10 = vsyncpa [#allocation4], 0  ;;  %s343_s12 = smov [#allocation2]  }
   0x3   :  { %s16_s13 = sshll.u32 %s343_s12, 4  ;;  %s17_s13 = int_to_ptr.vmem [resolvable:$true] %s16_s13 }
   0x4   :  { %s285_s14 = scalar_lea.vmem %s17_s13, 256  ;;  %p290_p1 = scmp.lt.s32.totalorder %s17_s13, %s17_s13 }
   0x5   :  { %p286_p0 = scmp.ne.s32.totalorder %s17_s13, %s285_s14  ;;  %p291_p2 = scmp.lt.s32.totalorder %s285_s14, %s285_s14 }
   0x7   :  { %p292_p3 = por %p291_p2, %p290_p1 }
   0x9   :  { %p293_p4 = pnand %p292_p3, %p286_p0 }
   0xb   :  { %296 = shalt.err (!%p293_p4)
}
   0xc   :  { %s344_s15 = smov 128   ;;  %s345_s16 = smov 8  }
   0xd   :  { %22 = dma.hbm_to_vmem [thread:$0]  %s389_s0, 256, %s17_s13, [#allocation3], %s344_s15, %s344_s15, %s345_s16  }
   0xe   :  { %s346_s19 = smov [#allocation5]  }
   0xf   :  { %s28_s20 = sshll.u32 %s346_s19, 4  ;;  %s29_s20 = int_to_ptr.vmem [resolvable:$true] %s28_s20 }
  0x10   :  { %s305_s21 = scalar_lea.vmem %s29_s20, 2048  ;;  %p310_p6 = scmp.lt.s32.totalorder %s29_s20, %s29_s20 }
  0x11   :  { %p306_p5 = scmp.ne.s32.totalorder %s29_s20, %s305_s21  ;;  %p311_p7 = scmp.lt.s32.totalorder %s305_s21, %s305_s21 }
  0x13   :  { %p312_p8 = por %p311_p7, %p310_p6 }
  0x15   :  { %p313_p9 = pnand %p312_p8, %p306_p5 }
  0x17   :  { %316 = shalt.err (!%p313_p9)
}
  0x18   :  { %34 = dma.hbm_to_vmem [thread:$0]  %s390_s1, 2048, %s29_s20, [#allocation6], %s344_s15, %s344_s15, %s345_s16  }
  0x19   :  { %337 = dma.done.wait [#allocation3], 256  }
  0x1a   :  { %338 = vsyncadd [#allocation3], 4294967040 }
  0x1b   :  { %339 = dma.done.wait [#allocation6], 2048  }
  0x1c   :  { %340 = vsyncadd [#allocation6], 4294965248  ;;  %v246_v0 = vld [vmem:[#allocation5 + $0x74] ss:$8 sps:$4 sm:$0xff]   ;;  %v248_v1 = vld [vmem:[#allocation5 + $0x70] ss:$8 sps:$4 sm:$0xff]  }
  0x1d   :  { %159 = vmatprep.subr.bf16.mxu0 %v246_v0  ;;  %v249_v2 = vld [vmem:[#allocation5 + $0x64] ss:$8 sps:$4 sm:$0xff]   ;;  %v251_v3 = vld [vmem:[#allocation5 + $0x60] ss:$8 sps:$4 sm:$0xff]   ;;  %v252_v4 = vld [vmem:[#allocation5 + $0x54] ss:$8 sps:$4 sm:$0xff]  }
  0x1e   :  { %160 = vmatpush1.bf16.xpose.msra.mxu0 %v248_v1  ;;  %v272_v5 = vld [vmem:[#allocation2 + $0x4] ss:$8 sps:$4 sm:$0xff]   ;;  %v254_v6 = vld [vmem:[#allocation5 + $0x50] ss:$8 sps:$4 sm:$0xff]   ;;  %v255_v7 = vld [vmem:[#allocation5 + $0x44] ss:$8 sps:$4 sm:$0xff]  }
  0x1f   :  { %161 = vmatprep.subr.bf16.mxu0 %v249_v2  ;;  %191 = vmatprep.mubr.bf16.mxu0 %v272_v5  ;;  %v257_v8 = vld [vmem:[#allocation5 + $0x40] ss:$8 sps:$4 sm:$0xff]   ;;  %v258_v9 = vld [vmem:[#allocation5 + $0x34] ss:$8 sps:$4 sm:$0xff]   ;;  %v260_v10 = vld [vmem:[#allocation5 + $0x30] ss:$8 sps:$4 sm:$0xff]  }
  0x20   :  { %v261_v11 = vld [vmem:[#allocation5 + $0x24] ss:$8 sps:$4 sm:$0xff]   ;;  %v263_v12 = vld [vmem:[#allocation5 + $0x20] ss:$8 sps:$4 sm:$0xff]   ;;  %v264_v13 = vld [vmem:[#allocation5 + $0x14] ss:$8 sps:$4 sm:$0xff]  }
  0x21   :  { %v266_v14 = vld [vmem:[#allocation5 + $0x10] ss:$8 sps:$4 sm:$0xff]   ;;  %v267_v15 = vld [vmem:[#allocation5 + $0x4] ss:$8 sps:$4 sm:$0xff]   ;;  %v269_v16 = vld [vmem:[#allocation5] ss:$8 sps:$4 sm:$0xff]  }
  0x22   :  { %v270_v17 = vld [vmem:[#allocation2] ss:$8 sps:$4 sm:$0xff]   ;;  %s347_s24 = smov [#allocation7]  }
  0x23   :  { %v222_v18 = vld [vmem:[%s391_s2] ss:$0 sm:$0xff]  ;;  %s209_s25 = sshll.u32 %s347_s24, 4  ;;  %s210_s25 = int_to_ptr.vmem [resolvable:$true] %s209_s25 }
  0x24   :  { %s317_s26 = scalar_lea.vmem %s210_s25, 256  ;;  %p322_p11 = scmp.lt.s32.totalorder %s210_s25, %s210_s25 }
  0x25   :  { %p318_p10 = scmp.ne.s32.totalorder %s210_s25, %s317_s26  ;;  %p323_p12 = scmp.lt.s32.totalorder %s317_s26, %s317_s26 }
  0x26   :  { %162 = vmatpush1.bf16.xpose.msra.mxu0 %v251_v3 }
  0x27   :  { %163 = vmatprep.subr.bf16.mxu0 %v252_v4  ;;  %p324_p13 = por %p323_p12, %p322_p11 }
  0x29   :  { %p325_p0 = pnand %p324_p13, %p318_p10 }
  0x2e   :  { %164 = vmatpush1.bf16.xpose.msra.mxu0 %v254_v6 }
  0x2f   :  { %165 = vmatprep.subr.bf16.mxu0 %v255_v7 }
  0x36   :  { %166 = vmatpush1.bf16.xpose.msra.mxu0 %v257_v8 }
  0x37   :  { %167 = vmatprep.subr.bf16.mxu0 %v258_v9 }
  0x3e   :  { %168 = vmatpush1.bf16.xpose.msra.mxu0 %v260_v10 }
  0x3f   :  { %169 = vmatprep.subr.bf16.mxu0 %v261_v11 }
  0x46   :  { %170 = vmatpush1.bf16.xpose.msra.mxu0 %v263_v12 }
  0x47   :  { %171 = vmatprep.subr.bf16.mxu0 %v264_v13 }
  0x4e   :  { %172 = vmatpush1.bf16.xpose.msra.mxu0 %v266_v14 }
  0x4f   :  { %173 = vmatprep.subr.bf16.mxu0 %v267_v15 }
  0x56   :  { %174 = vmatpush1.bf16.xpose.msra.mxu0 %v269_v16 }
  0x5d   :  { %192 = vmatmul.mubr.bf16.vlgmr.msra.gmra.mxu0 %v270_v17 }
 0x11d   :  { %v193_v19 = vpop.f32.mrf.mxu0 }
 0x11e   :  { %v194_v20 = vadd.f32 %v222_v18, %v193_v19 }
 0x11f   :  { %v195_v21 = vpop.f32.mrf.mxu0 }
 0x120   :  { %273 = vtanh.f32 %v194_v20 }
 0x121   :  { %v196_v22 = vpop.f32.mrf.mxu0 }
 0x122   :  { %v197_v23 = vadd.f32 %v222_v18, %v196_v22 }
 0x123   :  { %v198_v24 = vpop.f32.mrf.mxu0 }
 0x124   :  { %275 = vtanh.f32 %v197_v23 }
 0x12d   :  { %v274_v25 = vpop.eup %273 }
 0x12e   :  { %202 = vst [vmem:[#allocation7] sm:$0xff] %v274_v25 }
 0x131   :  { %v276_v26 = vpop.eup %275 }
 0x132   :  { %203 = vst [vmem:[#allocation7 + $0x8] sm:$0xff] %v276_v26 }
 0x133   :  { %328 = shalt.err (!%p325_p0)
}
 0x134   :  { %215 = dma.vmem_to_hbm [thread:$0]  %s210_s25, 256, %s392_s3, [#allocation4], %s344_s15, %s344_s15, %s345_s16  }
 0x135   :  { %341 = dma.done.wait [#allocation4], 256  }
 0x136   :  { %342 = vsyncadd [#allocation4], 4294967040 }
 0x137   :  { %219 = vsyncpa [#allocation3], 1 }
 0x138   :  { %220 = vsyncpa [#allocation6], 1 }
 0x139   :  { %221 = vsyncpa [#allocation4], 1 }

</bundles_post_ra>
